<compile_context>
chip_gen: v5e
topology: v5e:2x2
jax: 0.10.0
libtpu: 0.0.40
codegen_flags: <defaults>
</compile_context>

<pallas_src>
import functools

import jax
import jax.numpy as jnp
from jax import lax
from jax.experimental import pallas as pl
from jax.experimental.pallas import tpu as pltpu

EMBED_SIZE = 384


def _head_kernel(x_ref, w_ref, o_ref, *, block_b, seq_len, chunk):
    # x_ref: (block_b*T, E) f32   w_ref: (E, 3*chunk) bf16   o_ref: (block_b*T, chunk)
    T = seq_len

    # Cast x to bf16 on-chip (saves a standalone wrapper-side HBM pass).
    x = x_ref[...].astype(jnp.bfloat16)                       # (bb*T, E)

    # One fused QKV projection for the whole block: bf16 operands, f32 acc.
    qkv = jnp.dot(x, w_ref[...],
                  preferred_element_type=jnp.float32)         # (bb*T, 3*chunk)

    # Row split by multiples of the sublane tile (T == 8) is layout-preserving;
    # q/k/v splits land on 128-lane tile boundaries (chunk % 128 == 0), so the
    # slices below involve no lane shuffles.
    qkv = qkv.reshape(block_b, T, 3 * chunk)
    q = qkv[:, :, 0 * chunk:1 * chunk].astype(jnp.bfloat16)   # (bb, T, chunk)
    k = qkv[:, :, 1 * chunk:2 * chunk].astype(jnp.bfloat16)   # (bb, T, chunk)
    v = qkv[:, :, 2 * chunk:3 * chunk].astype(jnp.bfloat16)   # (bb, T, chunk)

    # Batched NT score contraction (no explicit transpose through the XLU);
    # 1/sqrt(H) is already folded into Wq.  Padded lanes are zero -> no effect.
    s = jnp.einsum('bqd,bkd->bqk', q, k,
                   preferred_element_type=jnp.float32)        # (bb, T, T) f32

    # torch.tril(s) then masked_fill(tmp == 0, -inf), fused into one select
    # (bug-for-bug with the PyTorch reference, which also -inf's genuine
    # zero scores).
    row = lax.broadcasted_iota(jnp.int32, (T, T), 0)
    col = lax.broadcasted_iota(jnp.int32, (T, T), 1)
    lower = (row >= col)[None, :, :]
    s = jnp.where(lower & (s != 0.0), s, -jnp.inf)

    # Softmax over the last dim in f32; reciprocal on the EUP slot
    # (approx ~1e-3 relative error; intentional, within test tolerance).
    m = jnp.max(s, axis=-1, keepdims=True)
    e = jnp.exp(s - m)
    p = e * pl.reciprocal(jnp.sum(e, axis=-1, keepdims=True), approx=True)

    out = jnp.einsum('bqk,bkd->bqd', p.astype(jnp.bfloat16), v,
                     preferred_element_type=jnp.float32)      # (bb, T, chunk)

    # Lane-dense store: full chunk (=128) lanes -> unmasked stores; the padded
    # lanes hold zeros and are sliced off in the wrapper.
    o_ref[...] = out.reshape(block_b * T, chunk).astype(o_ref.dtype)


def _pick_block_b(batch, seq):
    """Batch elements per grid step.

    Targets >=512 MXU rows per step (v6e/v7x sweet spot; per-step overhead is
    ~0.35us), but keeps at least two 'parallel' grid steps whenever batch >= 2
    so both v7x TensorCores get work.  Always divides the batch exactly.
    """
    target_rows = 512
    bb = min(batch, max(1, target_rows // max(seq, 1)))
    if batch >= 2:
        bb = min(bb, max(1, batch // 2))      # keep >=2 grid steps (v7x 2 TCs)
    while batch % bb != 0:
        bb -= 1
    return max(bb, 1)


def pack_qkv_weights(wq_t, wk_t, wv_t):
    """Pack pre-transposed (E, H) Q/K/V weights into one (E, 3*chunk) bf16 matrix.

    Call once and reuse: the 1/sqrt(H) score scale is folded into Wq (exact for
    power-of-two H, free on the host); each chunk is zero-padded to the 128-lane
    tile so all in-kernel splits and the output store are lane-tile aligned.
    NOTE: for H << 128 the zero-pad doubles projection columns.  That is free on
    v6e/v7x (the kernel stays HBM-bound) but costs MXU time on v5e -- fuse
    several heads so 3*H is a natural multiple of 128 if targeting v5e.
    """
    E, H = wq_t.shape
    scale = H ** (-0.5)
    chunk = ((H + 127) // 128) * 128

    def _pad(w):
        return w if chunk == H else jnp.pad(w, ((0, 0), (0, chunk - H)))

    w_qkv = jnp.concatenate([_pad(wq_t * scale), _pad(wk_t), _pad(wv_t)],
                            axis=1).astype(jnp.bfloat16)      # (E, 3*chunk)
    return w_qkv, chunk


@functools.partial(jax.jit, static_argnames=("head_size",))
def head_forward_packed(x, w_qkv, *, head_size):
    """x: (B, T, E); w_qkv: (E, 3*chunk) bf16 from pack_qkv_weights."""
    B, T, E = x.shape
    assert E == EMBED_SIZE
    chunk = w_qkv.shape[1] // 3
    out_dtype = x.dtype   # keep f32 like the reference; use bf16 if downstream allows

    block_b = _pick_block_b(B, T)
    grid = (B // block_b,)
    x_flat = x.reshape(B * T, E)       # no wrapper-side dtype cast: one HBM pass

    kernel = functools.partial(_head_kernel, block_b=block_b, seq_len=T,
                               chunk=chunk)
    out_flat = pl.pallas_call(
        kernel,
        out_shape=jax.ShapeDtypeStruct((B * T, chunk), out_dtype),
        grid_spec=pltpu.PrefetchScalarGridSpec(
            num_scalar_prefetch=0,
            grid=grid,
            in_specs=[
                pl.BlockSpec((block_b * T, E), lambda i: (i, 0)),
                # Constant index_map: same small weight tile every step.
                pl.BlockSpec((E, 3 * chunk), lambda i: (0, 0)),
            ],
            out_specs=pl.BlockSpec((block_b * T, chunk), lambda i: (i, 0)),
        ),
        compiler_params=pltpu.CompilerParams(
            dimension_semantics=("parallel",)),
    )(x_flat, w_qkv)

    # Drop the zero-padded lanes outside the kernel (store stays lane-dense).
    return out_flat.reshape(B, T, chunk)[:, :, :head_size]


def head_forward(x, wq_t, wk_t, wv_t):
    """Convenience wrapper: packs weights (ideally hoisted) then runs forward."""
    w_qkv, _ = pack_qkv_weights(wq_t, wk_t, wv_t)
    return head_forward_packed(x, w_qkv, head_size=wq_t.shape[1])


def _reference(x, wq_t, wk_t, wv_t):
    """Pure f32 JAX reference matching the PyTorch module exactly."""
    q = x @ wq_t
    k = x @ wk_t
    v = x @ wv_t
    s = (q @ jnp.swapaxes(k, -2, -1)) * (k.shape[-1] ** (-0.5))
    s = jnp.tril(s)
    s = jnp.where(s == 0.0, -jnp.inf, s)
    p = jax.nn.softmax(s, axis=-1)
    return p @ v


if __name__ == "__main__":
    B, T, H = 2, 8, 64
    key = jax.random.PRNGKey(0)
    kx, kq, kk, kv = jax.random.split(key, 4)

    x = jax.random.normal(kx, (B, T, EMBED_SIZE), dtype=jnp.float32)

    # Deterministic PyTorch-style Linear weights, stored pre-transposed (E, H).
    bound = 1.0 / (EMBED_SIZE ** 0.5)
    wq_t = jax.random.uniform(kq, (EMBED_SIZE, H), jnp.float32, -bound, bound)
    wk_t = jax.random.uniform(kk, (EMBED_SIZE, H), jnp.float32, -bound, bound)
    wv_t = jax.random.uniform(kv, (EMBED_SIZE, H), jnp.float32, -bound, bound)

    # Pack the fused QKV weight once; reuse across forward calls.
    w_qkv, _ = pack_qkv_weights(wq_t, wk_t, wv_t)

    out = jax.block_until_ready(head_forward_packed(x, w_qkv, head_size=H))
    ref = _reference(x, wq_t, wk_t, wv_t)

    assert out.shape == (B, T, H)
    assert bool(jnp.all(jnp.isfinite(out)))
    # bf16 matmul operands (f32 accumulation) + approx reciprocal set the floor.
    max_err = float(jnp.max(jnp.abs(out - ref)))
    assert jnp.allclose(out, ref, atol=5e-2, rtol=5e-2), max_err

    print("KERNEL_OK")
</pallas_src>

<mosaic_0001>
module attributes {stable_mosaic.version = 11 : i64} {
  func.func @_head_kernel(%arg0: i32, %arg1: memref<8x384xf32, #tpu.memory_space<vmem>>, %arg2: memref<384x384xbf16, #tpu.memory_space<vmem>>, %arg3: memref<8x128xf32, #tpu.memory_space<vmem>>) attributes {dimension_semantics = [#tpu.dimension_semantics<parallel>], iteration_bounds = array<i64: 2>, scalar_prefetch = 0 : i64, scratch_operands = 0 : i64, tpu.core_type = #tpu.core_type<tc>, window_params = [{transform_indices = @transform_0, window_bounds = array<i64: 8, 384>}, {pipeline_mode = #tpu.pipeline_mode<synchronous>, transform_indices = @transform_1, window_bounds = array<i64: 384, 384>}, {transform_indices = @transform_2, window_bounds = array<i64: 8, 128>}]} {
    %c0 = arith.constant 0 : index
    %c0_0 = arith.constant 0 : index
    %0 = vector.load %arg1[%c0, %c0_0] : memref<8x384xf32, #tpu.memory_space<vmem>>, vector<8x384xf32>
    %1 = arith.truncf %0 : vector<8x384xf32> to vector<8x384xbf16>
    %c0_1 = arith.constant 0 : index
    %c0_2 = arith.constant 0 : index
    %2 = vector.load %arg2[%c0_1, %c0_2] : memref<384x384xbf16, #tpu.memory_space<vmem>>, vector<384x384xbf16>
    %cst = arith.constant dense<0.000000e+00> : vector<8x384xf32>
    %3 = tpu.matmul %1, %2, %cst {dimension_numbers = #tpu.dot_dimension_numbers<[1], [0], [0], [1], [0, 0, 1, 1], [], []>} : vector<8x384xbf16>, vector<384x384xbf16>, vector<8x384xf32> -> vector<8x384xf32>
    %4 = vector.shape_cast %3 : vector<8x384xf32> to vector<1x8x384xf32>
    %5 = vector.extract_strided_slice %4 {offsets = [0, 0, 0], sizes = [1, 8, 128], strides = [1, 1, 1]} : vector<1x8x384xf32> to vector<1x8x128xf32>
    %6 = arith.truncf %5 : vector<1x8x128xf32> to vector<1x8x128xbf16>
    %7 = vector.extract_strided_slice %4 {offsets = [0, 0, 128], sizes = [1, 8, 128], strides = [1, 1, 1]} : vector<1x8x384xf32> to vector<1x8x128xf32>
    %8 = arith.truncf %7 : vector<1x8x128xf32> to vector<1x8x128xbf16>
    %9 = vector.extract_strided_slice %4 {offsets = [0, 0, 256], sizes = [1, 8, 128], strides = [1, 1, 1]} : vector<1x8x384xf32> to vector<1x8x128xf32>
    %10 = arith.truncf %9 : vector<1x8x128xf32> to vector<1x8x128xbf16>
    "tpu.trace_start"() <{level = 10 : i32, message = "bqd,bkd->bqk"}> : () -> ()
    %cst_3 = arith.constant dense<0.000000e+00> : vector<1x8x8xf32>
    %11 = tpu.matmul %6, %8, %cst_3 {dimension_numbers = #tpu.dot_dimension_numbers<[2], [2], [1], [1], [0, 0, 0, 1, 1, 1], [0], [0]>} : vector<1x8x128xbf16>, vector<1x8x128xbf16>, vector<1x8x8xf32> -> vector<1x8x8xf32>
    "tpu.trace_stop"() : () -> ()
    %12 = tpu.iota {dimensions = array<i32: 0>} : vector<8x8xi32>
    %13 = tpu.iota {dimensions = array<i32: 1>} : vector<8x8xi32>
    %14 = arith.cmpi sge, %12, %13 : vector<8x8xi32>
    %15 = vector.shape_cast %14 : vector<8x8xi1> to vector<1x8x8xi1>
    %cst_4 = arith.constant 0.000000e+00 : f32
    %16 = vector.broadcast %cst_4 : f32 to vector<1x8x8xf32>
    %17 = arith.cmpf one, %11, %16 : vector<1x8x8xf32>
    %18 = arith.andi %15, %17 : vector<1x8x8xi1>
    %cst_5 = arith.constant 0xFF800000 : f32
    %19 = vector.broadcast %cst_5 : f32 to vector<1x8x8xf32>
    %20 = arith.select %18, %11, %19 : vector<1x8x8xi1>, vector<1x8x8xf32>
    %cst_6 = arith.constant dense<0xFF800000> : vector<1x8xf32>
    %21 = vector.multi_reduction <maximumf>, %20, %cst_6 [2] : vector<1x8x8xf32> to vector<1x8xf32>
    %22 = vector.shape_cast %21 : vector<1x8xf32> to vector<1x8x1xf32>
    %23 = vector.broadcast %22 : vector<1x8x1xf32> to vector<1x8x8xf32>
    %24 = arith.subf %20, %23 : vector<1x8x8xf32>
    %25 = math.exp %24 : vector<1x8x8xf32>
    %cst_7 = arith.constant dense<0.000000e+00> : vector<1x8xf32>
    %26 = vector.multi_reduction <add>, %25, %cst_7 [2] : vector<1x8x8xf32> to vector<1x8xf32>
    %27 = vector.shape_cast %26 : vector<1x8xf32> to vector<1x8x1xf32>
    %28 = tpu.reciprocal %27 {approx = true} : vector<1x8x1xf32> -> vector<1x8x1xf32>
    %29 = vector.broadcast %28 : vector<1x8x1xf32> to vector<1x8x8xf32>
    %30 = arith.mulf %25, %29 : vector<1x8x8xf32>
    %31 = arith.truncf %30 : vector<1x8x8xf32> to vector<1x8x8xbf16>
    "tpu.trace_start"() <{level = 10 : i32, message = "bqk,bkd->bqd"}> : () -> ()
    %cst_8 = arith.constant dense<0.000000e+00> : vector<1x8x128xf32>
    %32 = tpu.matmul %31, %10, %cst_8 {dimension_numbers = #tpu.dot_dimension_numbers<[2], [1], [1], [2], [0, 0, 0, 1, 1, 2], [0], [0]>} : vector<1x8x8xbf16>, vector<1x8x128xbf16>, vector<1x8x128xf32> -> vector<1x8x128xf32>
    "tpu.trace_stop"() : () -> ()
    %33 = vector.shape_cast %32 : vector<1x8x128xf32> to vector<8x128xf32>
    %c0_9 = arith.constant 0 : index
    %c0_10 = arith.constant 0 : index
    %34 = vector.load %arg3[%c0_9, %c0_10] : memref<8x128xf32, #tpu.memory_space<vmem>>, vector<8x128xf32>
    tpu.vector_store %arg3[%c0_9, %c0_10], %33 {strides = array<i32>} : memref<8x128xf32, #tpu.memory_space<vmem>>, vector<8x128xf32>,
    return
  }
  func.func @transform_0(%arg0: i32) -> (i32, i32) {
    %c0_i32 = arith.constant 0 : i32
    %c0_i32_0 = arith.constant 0 : i32
    return %arg0, %c0_i32 : i32, i32
  }
  func.func @transform_1(%arg0: i32) -> (i32, i32) {
    %c0_i32 = arith.constant 0 : i32
    %c0_i32_0 = arith.constant 0 : i32
    %c0_i32_1 = arith.constant 0 : i32
    return %c0_i32, %c0_i32_0 : i32, i32
  }
  func.func @transform_2(%arg0: i32) -> (i32, i32) {
    %c0_i32 = arith.constant 0 : i32
    %c0_i32_0 = arith.constant 0 : i32
    return %arg0, %c0_i32 : i32, i32
  }
}

</mosaic_0001>

<bundles_post_ra>
// kernel: head_forward_packed.1
= control target key start
LH: loop header
LB: loop body
LE: loop exit
PB: predicated region body
PF: predicated region fallthrough
CT: control target
= control target key end

     0   :  { %7 = vsyncpa [#allocation3], 0  ;;  %s1687_s0 = inlined_call_operand.hbm [shape: f32[16,384], index: 0, kind: input, shape index: {}]   ;;  %s1688_s1 = inlined_call_operand.hbm [shape: bf16[384,384], index: 1, kind: input, shape index: {}]   ;;  %s1689_s2 = inlined_call_operand.hbm [shape: f32[16,128], index: 2, kind: output, shape index: {}]  }
   0x1   :  { %9 = vsyncpa [#allocation3 + $0x1], 0 }
   0x2   :  { %10 = vsyncpa [#allocation6], 0 }
   0x3   :  { %11 = vsyncpa [#allocation4], 0 }
   0x4   :  { %13 = vsyncpa [#allocation4 + $0x1], 0  ;;  %s1526_s9 = smov 0   ;;  %s1528_s10 = smov 0  }
   0x5   :  { %s1530_s11 = smov 0   ;;  %s1532_s12 = smov 0  }
   0x6 LB: > { %s108_s15 = sshll.u32 %s1688_s1, 4  ;;  %s1550_s16 = sadd.s32 4294967295, %s1506_s12   ;;  %s1506_s12 = sphi %s1532_s12, %s1699_s12   ;;  %s1502_s11 = sphi %s1530_s11, %s1698_s11   ;;  %s1498_s10 = sphi %s1528_s10, %s1697_s10   ;;  %s1494_s9 = sphi %s1526_s9, %s1696_s9   ;;  %s109_s15 = int_to_ptr.hbm [resolvable:$true] %s108_s15 }
   0x7   : > { %p938_p0 = scmp.ge.s32.totalorder %s1506_s12, 1  ;;  %p40_p1 = scmp.eq.s32.totalorder %s1550_s16, 0 }
   0x8   : > { %p97_p2 = scmp.lt.s32.totalorder %s1506_s12, 3  ;;  %s1508_s18 = smov [#allocation5]  }
   0x9   : > { %s110_s19 = sshll.u32 %s1508_s18, 4  ;;  %s1509_s20 = smov 192   ;;  %s111_s19 = int_to_ptr.vmem [resolvable:$true] %s110_s19 }
   0xa   : > { %p1555_p3 = pnand %p938_p0, %p97_p2  ;;  %s1510_s21 = smov 12  }
   0xb   : > { %s937_s22 = sadd.s32 4294967294, %s1506_s12   ;;  %s1566_s23 = sadd.s32 1, %s1506_s12  }
   0xc   : > { %p1321_p4 = pneg %p1555_p3  ;;  %s26_s24 = sadd.s32 1, %s1502_s11 }
   0xd   : > { %s23_s25 = ssub.s32 %s1506_s12, %s1566_s23  ;;  %p33_p7 = scmp.ne.s32.totalorder %s1502_s11, %s1498_s10 }
   0xe   : > { %p1322_p6 = pnand %p1321_p4, %p40_p1  ;;  %p24_p8 = scmp.eq.s32.totalorder %s23_s25, 0 }
   0xf   : > { %p34_p9 = scmp.eq.s32.totalorder %s1506_s12, 0  ;;  %p39_p10 = scmp.ne.s32.totalorder %s1498_s10, %s1494_s9 }
  0x10   : > { %1324 = dma.hbm_to_vmem [thread:$0]  (!%p1322_p6), %s109_s15, 9216, %s111_s19, [#allocation6], %s1509_s20, %s1509_s20, %s1510_s21  }
  0x11   : > { %p84_p11 = scmp.eq.s32.totalorder %s1550_s16, 1  ;;  %p35_p12 = por %p34_p9, %p33_p7 }
  0x12   : > { %s1578_s26 = scalar_select %p24_p8, %s1502_s11, %s26_s24  }
  0x13   : > { %p1582_p13 = por %p40_p1, %p39_p10  ;;  %p1586_p0 = por %p84_p11, %p33_p7 }
  0x14   : > { %p90_p2 = scmp.eq.s32.totalorder %s937_s22, 1  ;;  %p1334_p4 = scmp.lt.s32.totalorder %s1506_s12, 2 }
  0x15   : > { %s124_s29 = sand.u32 1, %s1502_s11   ;;  %s1311_s5 = smul.u32 24, %s1506_s12 }
  0x16   : > { %p1592_p6 = por %p90_p2, %p39_p10  ;;  %s1310_s3 = smul.u32 24, %s124_s29 }
  0x17   : > { %p1596_p8 = pnand %p1334_p4, %p35_p12  ;;  %s133_s8 = scalar_lea.hbm %s1687_s0, %s1311_s5 }
  0x18   : > { %s128_s13 = scalar_lea.vmem [#allocation2], %s1310_s3  ;;  %s135_s15 = sshll.u32 %s133_s8, 4  ;;  %s136_s15 = int_to_ptr.hbm [resolvable:$true] %s135_s15 }
  0x19   : > { %s137_s14 = sshll.u32 %s128_s13, 4  ;;  %s125_s18 = scalar_lea.sflag [#allocation3], %s124_s29  ;;  %s138_s14 = int_to_ptr.vmem [resolvable:$true] %s137_s14 }
  0x1a   : > { %s1406_s19 = sshra.s32 %s136_s15, 4  ;;  %p1410_p9 = pneg %p1596_p8  ;;  %s1407_s19 = int_to_ptr.hbm [resolvable:$true] %s1406_s19 }
  0x1b   : > { %s1408_s20 = scalar_lea.hbm %s1407_s19, 24  ;;  %s1413_s24 = scalar_lea.hbm %s1687_s0, 48 }
  0x1c   : > { %p1409_p7 = scmp.ne.s32.totalorder %s1407_s19, %s1408_s20  ;;  %p1414_p12 = scmp.lt.s32.totalorder %s1407_s19, %s1687_s0 }
  0x1d   : > { %p1415_p2 = scmp.lt.s32.totalorder %s1413_s24, %s1408_s20 }
  0x1e   : > { %p1411_p10 = pnand %p1410_p9, %p1409_p7 }
  0x1f   : > { %p1416_p4 = por %p1415_p2, %p1414_p12 }
  0x20   : > { %p1412_p11 = pneg %p1411_p10 }
  0x22   : > { %p1417_p5 = pnand %p1416_p4, %p1412_p11 }
  0x24   : > { %1420 = shalt.err (!%p1417_p5)
}
  0x25   : > { %1328 = dma.hbm_to_vmem [thread:$0]  (!%p1596_p8), %s136_s15, 384, %s138_s14, %s125_s18  }
  0x26   : > { %146 = sbr.rel (%p1555_p3) target bundleno = 776 (0x308), region = 28  ;;  %s1617_s29 = sand.u32 (!%p1555_p3), 1, %s1498_s10  }
  0x27   : > { %s1312_s3 = smul.u32 (!%p1555_p3), 24, %s1617_s29  ;;  %s149_s6 = scalar_lea.sflag (!%p1555_p3), [#allocation3], %s1617_s29 }
  0x29   : > { %s1621_s7 = scalar_lea.vmem (!%p1555_p3), [#allocation2], %s1312_s3 }
  0x2b   : > { %1481 = dma.done.wait (%p1582_p13), %s149_s6, 384  }
  0x2c   : > { %1483 = vsyncadd (%p1582_p13), %s149_s6, 4294966912 }
  0x2d   : > { %1485 = dma.done.wait (%p40_p1), [#allocation6], 9216  }
  0x2e   : > { %1487 = vsyncadd (%p40_p1), [#allocation6], 4294958080  ;;  %v1031_v0 = vld [vmem:[#allocation5 + $0xa8] sm:$0xf]  ;;  %v1260_v1 = vld [vmem:[#allocation5 + $0xb0] sm:$0xf0] }
  0x2f   : > { %v1127_v2 = vld [vmem:[#allocation5 + $0x168] sm:$0xf]  ;;  %v1032_v3 = vor.u32 %v1260_v1, %v1031_v0  ;;  %v1284_v4 = vld [vmem:[#allocation5 + $0x170] sm:$0xf0]  ;;  %v1019_v5 = vld [vmem:[#allocation5 + $0x90] sm:$0xf] }
  0x30   : > { %v1257_v6 = vld [vmem:[#allocation5 + $0x98] sm:$0xf0]  ;;  %v1128_v7 = vor.u32 %v1284_v4, %v1127_v2  ;;  %v1115_v8 = vld [vmem:[#allocation5 + $0x150] sm:$0xf]  ;;  %v1007_v11 = vld [vmem:[#allocation5 + $0x78] sm:$0xf] }
  0x31   : > { %v1281_v9 = vld [vmem:[#allocation5 + $0x158] sm:$0xf0]  ;;  %666 = vmatpush.bf16.msra.mxu0 %v1032_v3  ;;  %v1020_v10 = vor.u32 %v1257_v6, %v1019_v5  ;;  %v1254_v13 = vld [vmem:[#allocation5 + $0x80] sm:$0xf0]  ;;  %v1223_v14 = vld [vmem:[#allocation5 + $0x228] sm:$0xf] }
  0x32   : > { %679 = vmatpush.bf16.msra.mxu1 %v1128_v7  ;;  %v1116_v12 = vor.u32 %v1281_v9, %v1115_v8  ;;  %v1308_v15 = vld [vmem:[#allocation5 + $0x230] sm:$0xf0]  ;;  %v1103_v16 = vld [vmem:[#allocation5 + $0x138] sm:$0xf]  ;;  %v1278_v17 = vld [vmem:[#allocation5 + $0x140] sm:$0xf0]  ;;  %v1008_v22 = vor.u32 %v1254_v13, %v1007_v11 }
  0x33   : > { %v1224_v18 = vor.u32 %v1308_v15, %v1223_v14  ;;  %v1211_v19 = vld [vmem:[#allocation5 + $0x210] sm:$0xf]  ;;  %v1305_v20 = vld [vmem:[#allocation5 + $0x218] sm:$0xf0]  ;;  %v1259_v21 = vld [vmem:[#allocation5 + $0xac] sm:$0xf]  ;;  %v1104_v27 = vor.u32 %v1278_v17, %v1103_v16 }
  0x34   : > { %v995_v23 = vld [vmem:[#allocation5 + $0x60] sm:$0xf]  ;;  %v1251_v24 = vld [vmem:[#allocation5 + $0x68] sm:$0xf0]  ;;  %v1212_v25 = vor.u32 %v1305_v20, %v1211_v19  ;;  %v1033_v26 = vld [vmem:[#allocation5 + $0xb4] sm:$0xf0] }
  0x35   : > { %667 = vmatpush.bf16.msra.mxu0 %v1020_v10  ;;  %692 = vmatpush.bf16.msra.mxu2 %v1224_v18  ;;  %v1091_v28 = vld [vmem:[#allocation5 + $0x120] sm:$0xf]  ;;  %v1275_v29 = vld [vmem:[#allocation5 + $0x128] sm:$0xf0]  ;;  %v1036_v30 = vor.u32 %v1259_v21, %v1033_v26  ;;  %v1199_v31 = vld [vmem:[#allocation5 + $0x1f8] sm:$0xf]  ;;  %v996_v36 = vor.u32 %v1251_v24, %v995_v23 }
  0x36   : > { %680 = vmatpush.bf16.msra.mxu1 %v1116_v12  ;;  %v1302_v32 = vld [vmem:[#allocation5 + $0x200] sm:$0xf0]  ;;  %v1256_v33 = vld [vmem:[#allocation5 + $0x94] sm:$0xf]  ;;  %v1021_v34 = vld [vmem:[#allocation5 + $0x9c] sm:$0xf0]  ;;  %v1092_v41 = vor.u32 %v1275_v29, %v1091_v28 }
  0x37   : > { %705 = vmatpush.bf16.msra.mxu3 %v1036_v30  ;;  %v1024_v35 = vor.u32 %v1256_v33, %v1021_v34  ;;  %v983_v37 = vld [vmem:[#allocation5 + $0x48] sm:$0xf]  ;;  %v1248_v38 = vld [vmem:[#allocation5 + $0x50] sm:$0xf0]  ;;  %v1200_v39 = vor.u32 %v1302_v32, %v1199_v31  ;;  %v1187_v40 = vld [vmem:[#allocation5 + $0x1e0] sm:$0xf] }
  0x38   : > { %v1299_v42 = vld [vmem:[#allocation5 + $0x1e8] sm:$0xf0]  ;;  %v1253_v43 = vld [vmem:[#allocation5 + $0x7c] sm:$0xf]  ;;  %v1009_v44 = vld [vmem:[#allocation5 + $0x84] sm:$0xf0]  ;;  %v984_v48 = vor.u32 %v1248_v38, %v983_v37 }
  0x39   : > { %668 = vmatpush.bf16.msra.mxu0 %v1008_v22  ;;  %693 = vmatpush.bf16.msra.mxu2 %v1212_v25  ;;  %v1079_v45 = vld [vmem:[#allocation5 + $0x108] sm:$0xf]  ;;  %v1272_v46 = vld [vmem:[#allocation5 + $0x110] sm:$0xf0]  ;;  %v1012_v47 = vor.u32 %v1253_v43, %v1009_v44  ;;  %v971_v49 = vld [vmem:[#allocation5 + $0x30] sm:$0xf]  ;;  %v1188_v50 = vor.u32 %v1299_v42, %v1187_v40 }
  0x3a   : > { %681 = vmatpush.bf16.msra.mxu1 %v1104_v27  ;;  %v1250_v51 = vld [vmem:[#allocation5 + $0x64] sm:$0xf]  ;;  %v997_v52 = vld [vmem:[#allocation5 + $0x6c] sm:$0xf0]  ;;  %v1080_v53 = vor.u32 %v1272_v46, %v1079_v45  ;;  %v1245_v54 = vld [vmem:[#allocation5 + $0x38] sm:$0xf0] }
  0x3b   : > { %706 = vmatpush.bf16.msra.mxu3 %v1024_v35  ;;  %v1175_v55 = vld [vmem:[#allocation5 + $0x1c8] sm:$0xf]  ;;  %v1296_v56 = vld [vmem:[#allocation5 + $0x1d0] sm:$0xf0]  ;;  %v1067_v57 = vld [vmem:[#allocation5 + $0xf0] sm:$0xf]  ;;  %v1000_v59 = vor.u32 %v1250_v51, %v997_v52  ;;  %v972_v60 = vor.u32 %v1245_v54, %v971_v49 }
  0x3c   : > { %v1269_v58 = vld [vmem:[#allocation5 + $0xf8] sm:$0xf0]  ;;  %v959_v61 = vld [vmem:[#allocation5 + $0x18] sm:$0xf]  ;;  %v1176_v62 = vor.u32 %v1296_v56, %v1175_v55  ;;  %v1247_v63 = vld [vmem:[#allocation5 + $0x4c] sm:$0xf] }
  0x3d   : > { %669 = vmatpush.bf16.msra.mxu0 %v996_v36  ;;  %694 = vmatpush.bf16.msra.mxu2 %v1200_v39  ;;  %v985_v0 = vld [vmem:[#allocation5 + $0x54] sm:$0xf0]  ;;  %v1068_v1 = vor.u32 %v1269_v58, %v1067_v57  ;;  %v1242_v2 = vld [vmem:[#allocation5 + $0x20] sm:$0xf0]  ;;  %v1163_v3 = vld [vmem:[#allocation5 + $0x1b0] sm:$0xf] }
  0x3e   : > { %682 = vmatpush.bf16.msra.mxu1 %v1092_v41  ;;  %v1293_v4 = vld [vmem:[#allocation5 + $0x1b8] sm:$0xf0]  ;;  %v1055_v5 = vld [vmem:[#allocation5 + $0xd8] sm:$0xf]  ;;  %v1266_v6 = vld [vmem:[#allocation5 + $0xe0] sm:$0xf0]  ;;  %v988_v8 = vor.u32 %v1247_v63, %v985_v0  ;;  %v960_v9 = vor.u32 %v1242_v2, %v959_v61 }
  0x3f   : > { %707 = vmatpush.bf16.msra.mxu3 %v1012_v47  ;;  %v947_v7 = vld [vmem:[#allocation5] sm:$0xf]  ;;  %v1239_v10 = vld [vmem:[#allocation5 + $0x8] sm:$0xf0]  ;;  %v1164_v11 = vor.u32 %v1293_v4, %v1163_v3  ;;  %v1244_v12 = vld [vmem:[#allocation5 + $0x34] sm:$0xf]  ;;  %v1056_v14 = vor.u32 %v1266_v6, %v1055_v5 }
  0x40   : > { %v973_v13 = vld [vmem:[#allocation5 + $0x3c] sm:$0xf0]  ;;  %v1151_v16 = vld [vmem:[#allocation5 + $0x198] sm:$0xf]  ;;  %v1290_v17 = vld [vmem:[#allocation5 + $0x1a0] sm:$0xf0]  ;;  %v948_v24 = vor.u32 %v1239_v10, %v947_v7 }
  0x41   : > { %670 = vmatpush.bf16.msra.mxu0 %v984_v48  ;;  %695 = vmatpush.bf16.msra.mxu2 %v1188_v50  ;;  %v1043_v15 = vld [vmem:[#allocation5 + $0xc0] sm:$0xf]  ;;  %v1263_v18 = vld [vmem:[#allocation5 + $0xc8] sm:$0xf0]  ;;  %v1129_v20 = vld [vmem:[#allocation5 + $0x174] sm:$0xf0]  ;;  %v976_v23 = vor.u32 %v1244_v12, %v973_v13  ;;  %v1152_v25 = vor.u32 %v1290_v17, %v1151_v16 }
  0x42   : > { %683 = vmatpush.bf16.msra.mxu1 %v1080_v53  ;;  %v1283_v19 = vld [vmem:[#allocation5 + $0x16c] sm:$0xf]  ;;  %v1225_v22 = vld [vmem:[#allocation5 + $0x234] sm:$0xf0]  ;;  %v1241_v27 = vld [vmem:[#allocation5 + $0x1c] sm:$0xf]  ;;  %v1044_v29 = vor.u32 %v1263_v18, %v1043_v15 }
  0x43   : > { %708 = vmatpush.bf16.msra.mxu3 %v1000_v59  ;;  %v1307_v21 = vld [vmem:[#allocation5 + $0x22c] sm:$0xf]  ;;  %v961_v28 = vld [vmem:[#allocation5 + $0x24] sm:$0xf0]  ;;  %v1132_v30 = vor.u32 %v1283_v19, %v1129_v20  ;;  %v1139_v31 = vld [vmem:[#allocation5 + $0x180] sm:$0xf] }
  0x44   : > { %v180_v26 = vld [vmem:[%s1621_s7] sm:$0xff]  ;;  %v181_v33 = vld [vmem:[%s1621_s7 + $0x8] sm:$0xff]  ;;  %v1228_v34 = vor.u32 %v1307_v21, %v1225_v22  ;;  %v1117_v36 = vld [vmem:[#allocation5 + $0x15c] sm:$0xf0]  ;;  %v964_v40 = vor.u32 %v1241_v27, %v961_v28  ;;  %vm807_vm2 = vcmask 64512   ;;  %vm823_vm4 = vcmask 1043456  }
  0x45   : > { %671 = vmatpush.bf16.msra.mxu0 %v972_v60  ;;  %696 = vmatpush.bf16.msra.mxu2 %v1176_v62  ;;  %v1287_v32 = vld [vmem:[#allocation5 + $0x188] sm:$0xf0]  ;;  %v1280_v35 = vld [vmem:[#allocation5 + $0x154] sm:$0xf]  ;;  %v1213_v38 = vld [vmem:[#allocation5 + $0x21c] sm:$0xf0]  ;;  %v1633_v39 = vpack.c.bf16 %v180_v26, %v180_v26  ;;  %v1635_v42 = vpack.c.bf16 %v181_v33, %v181_v33 }
  0x46   : > { %684 = vmatpush.bf16.msra.mxu1 %v1068_v1  ;;  %v1304_v37 = vld [vmem:[#allocation5 + $0x214] sm:$0xf]  ;;  %v1140_v41 = vor.u32 %v1287_v32, %v1139_v31  ;;  %v182_v43 = vld [vmem:[%s1621_s7 + $0x10] sm:$0xff]  ;;  %v949_v45 = vld [vmem:[#allocation5 + $0xc] sm:$0xf0]  ;;  %v1120_v46 = vor.u32 %v1280_v35, %v1117_v36  ;;  %s1235_s17 = sshll.u32 %s1550_s16, 3 }
  0x47   : > { %709 = vmatpush.bf16.msra.mxu3 %v988_v8  ;;  %v1238_v44 = vld [vmem:[#allocation5 + $0x4] sm:$0xf]  ;;  %v1216_v47 = vor.u32 %v1304_v37, %v1213_v38  ;;  %v1277_v48 = vld [vmem:[#allocation5 + $0x13c] sm:$0xf]  ;;  %v1105_v49 = vld [vmem:[#allocation5 + $0x144] sm:$0xf0]  ;;  %v1639_v52 = vpack.c.bf16 %v182_v43, %v182_v43  ;;  %s852_s13 = scalar_lea.hbm %s1689_s2, %s1235_s17 }
  0x48   : > { %v1301_v50 = vld [vmem:[#allocation5 + $0x1fc] sm:$0xf]  ;;  %v1201_v51 = vld [vmem:[#allocation5 + $0x204] sm:$0xf0]  ;;  %v952_v53 = vor.u32 %v1238_v44, %v949_v45  ;;  %v1108_v54 = vor.u32 %v1277_v48, %v1105_v49  ;;  %v1274_v56 = vld [vmem:[#allocation5 + $0x124] sm:$0xf] }
  0x49   : > { %672 = vmatpush.bf16.msra.mxu0 %v960_v9  ;;  %697 = vmatpush.bf16.msra.mxu2 %v1164_v11  ;;  %v1204_v55 = vor.u32 %v1301_v50, %v1201_v51  ;;  %v1093_v57 = vld [vmem:[#allocation5 + $0x12c] sm:$0xf0]  ;;  %v1298_v58 = vld [vmem:[#allocation5 + $0x1e4] sm:$0xf]  ;;  %v1271_v62 = vld [vmem:[#allocation5 + $0x10c] sm:$0xf] }
  0x4a   : > { %685 = vmatpush.bf16.msra.mxu1 %v1056_v14  ;;  %v1189_v59 = vld [vmem:[#allocation5 + $0x1ec] sm:$0xf0]  ;;  %v1096_v60 = vor.u32 %v1274_v56, %v1093_v57  ;;  %v1081_v63 = vld [vmem:[#allocation5 + $0x114] sm:$0xf0]  ;;  %v1295_v0 = vld [vmem:[#allocation5 + $0x1cc] sm:$0xf] }
  0x4b   : > { %710 = vmatpush.bf16.msra.mxu3 %v976_v23  ;;  %v1192_v61 = vor.u32 %v1298_v58, %v1189_v59  ;;  %v1177_v1 = vld [vmem:[#allocation5 + $0x1d4] sm:$0xf0]  ;;  %v1084_v2 = vor.u32 %v1271_v62, %v1081_v63  ;;  %v1268_v4 = vld [vmem:[#allocation5 + $0xf4] sm:$0xf]  ;;  %v1069_v5 = vld [vmem:[#allocation5 + $0xfc] sm:$0xf0] }
  0x4c   : > { %v1180_v3 = vor.u32 %v1295_v0, %v1177_v1  ;;  %v1292_v6 = vld [vmem:[#allocation5 + $0x1b4] sm:$0xf]  ;;  %v1165_v7 = vld [vmem:[#allocation5 + $0x1bc] sm:$0xf0]  ;;  %v1072_v8 = vor.u32 %v1268_v4, %v1069_v5  ;;  %v1265_v10 = vld [vmem:[#allocation5 + $0xdc] sm:$0xf] }
  0x4d   : > { %673 = vmatpush.bf16.msra.mxu0 %v948_v24  ;;  %698 = vmatpush.bf16.msra.mxu2 %v1152_v25  ;;  %v1168_v9 = vor.u32 %v1292_v6, %v1165_v7  ;;  %v1057_v11 = vld [vmem:[#allocation5 + $0xe4] sm:$0xf0]  ;;  %v1289_v12 = vld [vmem:[#allocation5 + $0x19c] sm:$0xf]  ;;  %v1262_v16 = vld [vmem:[#allocation5 + $0xc4] sm:$0xf] }
  0x4e   : > { %686 = vmatpush.bf16.msra.mxu1 %v1044_v29  ;;  %v1153_v13 = vld [vmem:[#allocation5 + $0x1a4] sm:$0xf0]  ;;  %v1060_v14 = vor.u32 %v1265_v10, %v1057_v11  ;;  %v1045_v17 = vld [vmem:[#allocation5 + $0xcc] sm:$0xf0]  ;;  %v1286_v18 = vld [vmem:[#allocation5 + $0x184] sm:$0xf] }
  0x4f   : > { %711 = vmatpush.bf16.msra.mxu3 %v964_v40  ;;  %v1156_v15 = vor.u32 %v1289_v12, %v1153_v13  ;;  %v1141_v19 = vld [vmem:[#allocation5 + $0x18c] sm:$0xf0]  ;;  %v1048_v20 = vor.u32 %v1262_v16, %v1045_v17  ;;  %v1261_v43 = vld [vmem:[#allocation5 + $0xb8] sm:$0xf0]  ;;  %v1258_v48 = vld [vmem:[#allocation5 + $0xa0] sm:$0xf0] }
  0x50   : > { %674 = vmatmul.bf16.vlgmr.msra.gmra.mxu0 %v1633_v39  ;;  %v1144_v21 = vor.u32 %v1286_v18, %v1141_v19  ;;  %v1135_v44 = vld [vmem:[#allocation5 + $0x170] sm:$0xf]  ;;  %v1123_v50 = vld [vmem:[#allocation5 + $0x158] sm:$0xf]  ;;  %v1282_v51 = vld [vmem:[#allocation5 + $0x160] sm:$0xf0]  ;;  %v799_v18 = vlaneseq }
  0x51   : > { %718 = vmatpush.bf16.msrb.mxu0 %v1132_v30  ;;  %699 = vmatpush.bf16.msra.mxu2 %v1140_v41  ;;  %v1039_v41 = vld [vmem:[#allocation5 + $0xb0] sm:$0xf]  ;;  %v1255_v56 = vld [vmem:[#allocation5 + $0x88] sm:$0xf0]  ;;  %v1309_v58 = vld [vmem:[#allocation5 + $0x238] sm:$0xf0] }
  0x52   : > { %731 = vmatpush.bf16.msrb.mxu1 %v1228_v34  ;;  %v1040_v45 = vor.u32 %v1261_v43, %v1039_v41  ;;  %v1231_v57 = vld [vmem:[#allocation5 + $0x230] sm:$0xf]  ;;  %v1111_v59 = vld [vmem:[#allocation5 + $0x140] sm:$0xf]  ;;  %v1219_v62 = vld [vmem:[#allocation5 + $0x218] sm:$0xf] }
  0x53   : > { %687 = vmatmul.bf16.vlgmr.msra.gmra.mxu1 %v1635_v42  ;;  %712 = vmatpush.bf16.msra.mxu3 %v952_v53  ;;  %v1306_v63 = vld [vmem:[#allocation5 + $0x220] sm:$0xf0]  ;;  %v1003_v1 = vld [vmem:[#allocation5 + $0x68] sm:$0xf]  ;;  %v1252_v4 = vld [vmem:[#allocation5 + $0x70] sm:$0xf0] }
  0x54   : > { %700 = vmatmul.bf16.vlgmr.msra.gmra.mxu2 %v1639_v52  ;;  %v1207_v5 = vld [vmem:[#allocation5 + $0x200] sm:$0xf]  ;;  %v1303_v6 = vld [vmem:[#allocation5 + $0x208] sm:$0xf0]  ;;  %v1099_v7 = vld [vmem:[#allocation5 + $0x128] sm:$0xf] }
  0x55   : > { %719 = vmatpush.bf16.msrb.mxu0 %v1120_v46  ;;  %v1285_v46 = vld [vmem:[#allocation5 + $0x178] sm:$0xf0]  ;;  %744 = vmatpush.bf16.msrb.mxu2 %v1040_v45  ;;  %v991_v10 = vld [vmem:[#allocation5 + $0x50] sm:$0xf]  ;;  %v1208_v11 = vor.u32 %v1303_v6, %v1207_v5  ;;  %v955_v41 = vld [vmem:[#allocation5 + $0x8] sm:$0xf] }
  0x56   : > { %732 = vmatpush.bf16.msrb.mxu1 %v1216_v47  ;;  %713 = vmatmul.bf16.vlgmr.msra.gmra.mxu3 %v1633_v39  ;;  %v1027_v47 = vld [vmem:[#allocation5 + $0x98] sm:$0xf]  ;;  %v1136_v49 = vor.u32 %v1285_v46, %v1135_v44  ;;  %v1249_v13 = vld [vmem:[#allocation5 + $0x58] sm:$0xf0]  ;;  %v1087_v16 = vld [vmem:[#allocation5 + $0x110] sm:$0xf] }
  0x57   : > { %v1028_v53 = vor.u32 %v1258_v48, %v1027_v47  ;;  %v1273_v17 = vld [vmem:[#allocation5 + $0x118] sm:$0xf0]  ;;  %v992_v19 = vor.u32 %v1249_v13, %v991_v10  ;;  %v1240_v46 = vld [vmem:[#allocation5 + $0x10] sm:$0xf0]  ;;  %v1159_v47 = vld [vmem:[#allocation5 + $0x1a0] sm:$0xf] }
  0x58   : > { %757 = vmatpush.bf16.msrb.mxu3 %v1136_v49  ;;  %v1291_v48 = vld [vmem:[#allocation5 + $0x1a8] sm:$0xf0]  ;;  %v1051_v49 = vld [vmem:[#allocation5 + $0xc8] sm:$0xf]  ;;  %s944_s27 = sshll.u32 %s1617_s29, 3  ;;  %s856_s18 = sshll.u32 %s852_s13, 4  ;;  %s857_s18 = int_to_ptr.hbm [resolvable:$true] %s856_s18 }
  0x59   : > { %720 = vmatpush.bf16.msrb.mxu0 %v1108_v54  ;;  %v1015_v54 = vld [vmem:[#allocation5 + $0x80] sm:$0xf]  ;;  %745 = vmatpush.bf16.msrb.mxu2 %v1028_v53  ;;  %v956_v53 = vor.u32 %v1240_v46, %v955_v41  ;;  %s178_s14 = scalar_lea.vmem [#allocation7], %s944_s27  ;;  %s842_s19 = scalar_lea.sflag [#allocation4], %s1617_s29 }
  0x5a   : > { %733 = vmatpush.bf16.msrb.mxu1 %v1204_v55  ;;  %v1124_v55 = vor.u32 %v1282_v51, %v1123_v50  ;;  %v1016_v0 = vor.u32 %v1255_v56, %v1015_v54  ;;  %v1264_v50 = vld [vmem:[#allocation5 + $0xd0] sm:$0xf0]  ;;  %v1160_v54 = vor.u32 %v1291_v48, %v1159_v47  ;;  %s854_s15 = sshll.u32 %s178_s14, 4  ;;  %s1450_s20 = sshra.s32 %s857_s18, 4  ;;  %s855_s15 = int_to_ptr.vmem [resolvable:$true] %s854_s15  ;;  %s1451_s20 = int_to_ptr.hbm [resolvable:$true] %s1450_s20 }
  0x5b   : > { %v1052_v56 = vor.u32 %v1264_v50, %v1051_v49  ;;  %s1452_s21 = scalar_lea.hbm %s1451_s20, 8  ;;  %s1456_s24 = scalar_lea.hbm %s1689_s2, 16 }
  0x5c   : > { %758 = vmatpush.bf16.msrb.mxu3 %v1124_v55  ;;  %p1453_p1 = scmp.ne.s32.totalorder %s1451_s20, %s1452_s21  ;;  %p1457_p13 = scmp.lt.s32.totalorder %s1451_s20, %s1689_s2 }
  0x5d   : > { %721 = vmatpush.bf16.msrb.mxu0 %v1096_v60  ;;  %v1279_v60 = vld [vmem:[#allocation5 + $0x148] sm:$0xf0]  ;;  %746 = vmatpush.bf16.msrb.mxu2 %v1016_v0  ;;  %p1458_p8 = scmp.lt.s32.totalorder %s1456_s24, %s1452_s21 }
  0x5e   : > { %734 = vmatpush.bf16.msrb.mxu1 %v1192_v61  ;;  %v1232_v61 = vor.u32 %v1309_v58, %v1231_v57  ;;  %v1147_v57 = vld [vmem:[#allocation5 + $0x188] sm:$0xf]  ;;  %v1288_v58 = vld [vmem:[#allocation5 + $0x190] sm:$0xf0]  ;;  %p1454_p3 = pnand %p1453_p1, %p1586_p0 }
  0x5f   : > { %p1459_p7 = por %p1458_p8, %p1457_p13 }
  0x60   : > { %p1455_p5 = pneg %p1454_p3 }
  0x61   : > { %722 = vmatpush.bf16.msrb.mxu0 %v1084_v2  ;;  %v1220_v2 = vor.u32 %v1306_v63, %v1219_v62 }
  0x62   : > { %735 = vmatpush.bf16.msrb.mxu1 %v1180_v3  ;;  %v1112_v3 = vor.u32 %v1279_v60, %v1111_v59  ;;  %v1148_v59 = vor.u32 %v1288_v58, %v1147_v57  ;;  %p1460_p9 = pnand %p1459_p7, %p1455_p5 }
  0x64   : > { %759 = vmatpush.bf16.msrb.mxu3 %v1112_v3 }
  0x65   : > { %723 = vmatpush.bf16.msrb.mxu0 %v1072_v8  ;;  %v1276_v8 = vld [vmem:[#allocation5 + $0x130] sm:$0xf0] }
  0x66   : > { %736 = vmatpush.bf16.msrb.mxu1 %v1168_v9  ;;  %v1004_v9 = vor.u32 %v1252_v4, %v1003_v1  ;;  %v1100_v12 = vor.u32 %v1276_v8, %v1099_v7 }
  0x68   : > { %747 = vmatpush.bf16.msrb.mxu2 %v1004_v9  ;;  %760 = vmatpush.bf16.msrb.mxu3 %v1100_v12 }
  0x69   : > { %724 = vmatpush.bf16.msrb.mxu0 %v1060_v14  ;;  %v1195_v14 = vld [vmem:[#allocation5 + $0x1e8] sm:$0xf] }
  0x6a   : > { %737 = vmatpush.bf16.msrb.mxu1 %v1156_v15  ;;  %v1300_v15 = vld [vmem:[#allocation5 + $0x1f0] sm:$0xf0] }
  0x6c   : > { %748 = vmatpush.bf16.msrb.mxu2 %v992_v19 }
  0x6d   : > { %725 = vmatpush.bf16.msrb.mxu0 %v1048_v20  ;;  %v979_v20 = vld [vmem:[#allocation5 + $0x38] sm:$0xf] }
  0x6e   : > { %738 = vmatpush.bf16.msrb.mxu1 %v1144_v21  ;;  %v1196_v21 = vor.u32 %v1300_v15, %v1195_v14 }
  0x70   : > { %726 = vmatmul.bf16.vlgmr.msrb.gmra.mxu0 %v1635_v42 }
  0x71   : > { %739 = vmatmul.bf16.vlgmr.msrb.gmra.mxu1 %v1639_v52  ;;  %770 = vmatpush.bf16.msra.mxu0 %v1232_v61 }
  0x75   : > { %771 = vmatpush.bf16.msra.mxu0 %v1220_v2 }
  0x79   : > { %772 = vmatpush.bf16.msra.mxu0 %v1208_v11 }
  0x7d   : > { %773 = vmatpush.bf16.msra.mxu0 %v1196_v21 }
  0xcd   : > { %v675_v22 = vpop.f32.mrf.mxu0 }
  0xd0   : > { %v688_v23 = vpop.f32.mrf.mxu1 }
  0xd1   : > { %v689_v34 = vadd.f32 %v688_v23, %v675_v22  ;;  %v1088_v22 = vor.u32 %v1273_v17, %v1087_v16  ;;  %v1246_v23 = vld [vmem:[#allocation5 + $0x40] sm:$0xf0] }
  0xd3   : > { %761 = vmatpush.bf16.msrb.mxu3 %v1088_v22 }
  0xd5   : > { %v677_v24 = vpop.f32.mrf.mxu0 }
  0xd6   : > { %v1183_v24 = vld [vmem:[#allocation5 + $0x1d0] sm:$0xf] }
  0xd7   : > { %v701_v26 = vpop.f32.mrf.mxu2 }
  0xd8   : > { %v690_v25 = vpop.f32.mrf.mxu1  ;;  %v702_v36 = vadd.f32 %v701_v26, %v689_v34  ;;  %v1075_v26 = vld [vmem:[#allocation5 + $0xf8] sm:$0xf]  ;;  %v1243_v34 = vld [vmem:[#allocation5 + $0x28] sm:$0xf0] }
  0xd9   : > { %v714_v27 = vpop.f32.mrf.mxu3  ;;  %v1297_v25 = vld [vmem:[#allocation5 + $0x1d8] sm:$0xf0] }
  0xda   : > { %v783_v40 = vpack.c.bf16 %v702_v36, %v702_v36  ;;  %v1294_v36 = vld [vmem:[#allocation5 + $0x1c0] sm:$0xf0] }
  0xdf   : > { %v703_v28 = vpop.f32.mrf.mxu2 }
  0xe0   : > { %v800_v28 = vshrl.u32 %v799_v18, 7 }
  0xe1   : > { %v716_v29 = vpop.f32.mrf.mxu3 }
  0xe2   : > { %v802_v29 = vand.u32 127, %v799_v18 }
  0xe4   : > { %vm803_vm0 = vcmp.ge.s32.totalorder %v800_v28, %v802_v29 }
  0xed   : > { %v727_v30 = vpop.f32.mrf.mxu0 }
  0xee   : > { %v728_v31 = vadd.f32 %v727_v30, %v714_v27  ;;  %v740_v32 = vpop.f32.mrf.mxu1  ;;  %v1270_v27 = vld [vmem:[#allocation5 + $0x100] sm:$0xf0]  ;;  %v980_v30 = vor.u32 %v1246_v23, %v979_v20 }
  0xf0   : > { %v741_v33 = vadd.f32 %v740_v32, %v728_v31  ;;  %v967_v31 = vld [vmem:[#allocation5 + $0x20] sm:$0xf]  ;;  %v1184_v32 = vor.u32 %v1297_v25, %v1183_v24  ;;  %749 = vmatpush.bf16.msrb.mxu2 %v980_v30 }
  0xf2   : > { %v784_v35 = vpack.c.bf16 %v741_v33, %v741_v33  ;;  %v1076_v33 = vor.u32 %v1270_v27, %v1075_v26  ;;  %774 = vmatpush.bf16.msra.mxu0 %v1184_v32 }
  0xf4   : > { %793 = vmatpush.bf16.xpose.msra.mxu1 %v784_v35  ;;  %v1171_v35 = vld [vmem:[#allocation5 + $0x1b8] sm:$0xf]  ;;  %762 = vmatpush.bf16.msrb.mxu3 %v1076_v33 }
  0xf5   : > { %v729_v37 = vpop.f32.mrf.mxu0  ;;  %v1172_v43 = vor.u32 %v1294_v36, %v1171_v35 }
  0xf6   : > { %v742_v38 = vpop.f32.mrf.mxu1  ;;  %v1063_v37 = vld [vmem:[#allocation5 + $0xe0] sm:$0xf] }
  0xf7   : > { %v1267_v38 = vld [vmem:[#allocation5 + $0xe8] sm:$0xf0]  ;;  %775 = vmatpush.bf16.msra.mxu0 %v1172_v43 }
  0xf8   : > { %v1064_v45 = vor.u32 %v1267_v38, %v1063_v37 }
  0xfa   : > { %763 = vmatpush.bf16.msrb.mxu3 %v1064_v45 }
  0xfb   : > { %794 = vmatmul.bf16.vlgmr.msra.gmra.mxu1 %v783_v40  ;;  %v968_v40 = vor.u32 %v1243_v34, %v967_v31  ;;  %776 = vmatpush.bf16.msra.mxu0 %v1160_v54 }
  0xfd   : > { %750 = vmatpush.bf16.msrb.mxu2 %v968_v40 }
  0xfe   : > { %764 = vmatpush.bf16.msrb.mxu3 %v1052_v56 }
  0xff   : > { %777 = vmatpush.bf16.msra.mxu0 %v1148_v59 }
 0x101   : > { %751 = vmatpush.bf16.msrb.mxu2 %v956_v53  ;;  %765 = vmatmul.bf16.vlgmr.msrb.gmra.mxu3 %v1635_v42 }
 0x102   : > { %778 = vmatmul.bf16.vlgmr.msra.gmra.mxu0 %v1639_v52 }
 0x104   : > { %752 = vmatmul.bf16.vlgmr.msrb.gmra.mxu2 %v1633_v39 }
 0x178   : > { %v795_v44 = vpop.f32.mrf.mxu1 }
 0x179   : > { %vm804_vm1 = vcmp.ne.f32.partialorder %v795_v44, 0.0 }
 0x17a   : > { %vm805_vm3 = vmand %vm803_vm0, %vm804_vm1 }
 0x17b   : > { %v806_v51 = vsel %vm805_vm3, %v795_v44, -inf }
 0x17c   : > { %v808_v55 = vsel %vm807_vm2, %v806_v51, -inf }
 0x17d   : > { %809 = vmax.xlane.f32.xlu0 %v808_v55 }
 0x17f   : > { %v779_v2 = vpop.f32.mrf.mxu0 }
 0x180   : > { %v797_v60 = vpop.f32.mrf.mxu1 }
 0x184   : > { %v766_v4 = vpop.f32.mrf.mxu3 }
 0x187   : > { %v753_v3 = vpop.f32.mrf.mxu2  ;;  %v781_v6 = vpop.f32.mrf.mxu0 }
 0x188   : > { %v767_v5 = vadd.f32 %v766_v4, %v753_v3 }
 0x18a   : > { %v780_v39 = vadd.f32 %v779_v2, %v767_v5 }
 0x18c   : > { %v785_v42 = vpack.c.bf16 %v780_v39, %v780_v39  ;;  %v768_v8 = vpop.f32.mrf.mxu3 }
 0x18e   : > { %v825_v7 = vsel %vm823_vm4, %v785_v42, 0 }
 0x18f   : > { %v755_v52 = vpop.f32.mrf.mxu2  ;;  %834 = vmatpush.bf16.msra.mxu2 %v825_v7 }
 0x1f0   : > { %v810_v61 = vpop.xlane.xlu0 %809 }
 0x1f1   : > { %v811_v62 = vsub.f32 %v806_v51, %v810_v61 }
 0x1f3   : > { %v812_v63 = vmul.f32 1.442695, %v811_v62 }
 0x1f5   : > { %1372 = vpow2.f32 %v812_v63 }
 0x1fb   : > { %v1373_v0 = vpop.eup %1372 }
 0x1fc   : > { %v814_v1 = vsel %vm807_vm2, %v1373_v0, 0.0 }
 0x1fd   : > { %815 = vadd.xlane.f32.xlu0 %v814_v1 }
 0x270   : > { %v816_v9 = vpop.xlane.xlu0 %815 }
 0x271   : > { %1374 = vrcp.f32 %v816_v9 }
 0x277   : > { %v1375_v10 = vpop.eup %1374 }
 0x278   : > { %v818_v11 = vmul.f32 %v1375_v10, %v1373_v0 }
 0x27a   : > { %v819_v12 = vpack.c.bf16 %v818_v11, %v818_v11 }
 0x27c   : > { %1233 = vmatmul.msk.bf16.vlgmr.msra.gmra.mxu2 %vm807_vm2, %v819_v12 }
 0x2ff   : > { %v836_v13 = vpop.f32.mrf.mxu2 }
 0x300   : > { %840 = vst [vmem:[%s178_s14] sm:$0xff] %v836_v13 }
 0x301   : > { %1463 = shalt.err (!%p1460_p9)
}
 0x302   : > { %1319 = dma.vmem_to_hbm [thread:$0]  (%p1586_p0), %s855_s15, 128, %s857_s18, %s842_s19  }
 0x307   : > { %v838_v14 = vpop.f32.mrf.mxu2 }
 0x308 PF: > { %s868_s29 = sand.u32 1, %s1494_s9   ;;  %p1695_p10 = scmp.ge.s32.totalorder %s1506_s12, 2 }
 0x309   : > { %s869_s3 = scalar_lea.sflag [#allocation4], %s868_s29 }
 0x30a   : > { %p1330_p11 = pnand %p1695_p10, %p1592_p6 }
 0x30c   : > { %p1331_p12 = pneg %p1330_p11 }
 0x30e   : > { %1489 = dma.done.wait (%p1331_p12), %s869_s3, 128  }
 0x30f   : > { %1491 = vsyncadd (%p1331_p12), %s869_s3, 4294967168  ;;  %p16_p2 = scmp.ge.s32.totalorder %s1566_s23, 4   ;;  %s1696_s9 = smov %s1498_s10 }
 0x310   : > { %s1697_s10 = smov %s1502_s11  ;;  %s1698_s11 = smov %s1578_s26 }
 0x311   : > { %s1699_s12 = smov %s1566_s23  ;;  %18 = sbr.rel (!%p16_p2) target bundleno = 6 (0x6), region = 77 }
 0x316   :  { %875 = vsyncpa [#allocation3], 1 }
 0x317   :  { %877 = vsyncpa [#allocation3 + $0x1], 1 }
 0x318   :  { %878 = vsyncpa [#allocation6], 1 }
 0x319   :  { %879 = vsyncpa [#allocation4], 1 }
 0x31a   :  { %881 = vsyncpa [#allocation4 + $0x1], 1 }

</bundles_post_ra>
